<compile_context>
chip_gen: v5e
topology: v5e:2x2
jax: 0.10.0
libtpu: 0.0.40
codegen_flags: <defaults>
</compile_context>

<pallas_src>
import functools

import jax
import jax.numpy as jnp
import numpy as np
from jax.experimental import pallas as pl
from jax.experimental.pallas import tpu as pltpu


def lstm_fused_kernel(x_ref, wpk_ref, hc_ref, fcpk_ref, out_ref, xg_ref, hs_ref):
    """Whole forward pass (LSTM over T steps + fc + softmax) in one invocation.

    x_ref:    (T*B, I)   time-major input rows (row t*B + b)
    wpk_ref:  (48, 4H)   rows [0:I]=W_ih^T, [I:I+H]=W_hh^T, [I+H]=b_ih+b_hh, rest zero-pad
    hc_ref:   (2B, H)    rows [0:B]=h0, [B:2B]=c0
    fcpk_ref: (40, Opad) rows [0:H]=W_fc^T (zero-padded lanes), [H]=b_fc (padded lanes=-1e30)
    out_ref:  (T*B, Opad) time-major softmax(fc(h_t)), lane-dense
    xg_ref:   (T*B, 4H)  VMEM scratch (hoisted input projection)
    hs_ref:   (T*B, H)   VMEM scratch (all hidden states, time-major)
    """
    twoB, H = hc_ref.shape
    B = twoB // 2
    BT, I = x_ref.shape
    T = BT // B

    # ---- unpack the packed operands (static, sublane-aligned slices) ---------
    w_ih = wpk_ref[0:I, :]                 # (I, 4H)
    w_hh = wpk_ref[I:I + H, :]             # (H, 4H)
    b_g = wpk_ref[I + H:I + H + 1, :]      # (1, 4H)

    # ---- hoisted input projection for ALL timesteps, spilled to VMEM ---------
    xg_ref[...] = jnp.dot(x_ref[...], w_ih,
                          preferred_element_type=jnp.float32) + b_g

    h0 = hc_ref[0:B, :]
    c0 = hc_ref[B:2 * B, :]

    # ---- serial recurrence: per step one (B,H)x(H,4H) matmul + VPU/EUP work --
    def step(t, carry):
        h, c = carry
        row = pl.multiple_of(t * B, B)
        gates = xg_ref[pl.ds(row, B), :] + jnp.dot(
            h, w_hh, preferred_element_type=jnp.float32)          # (B, 4H)
        # Activate the whole gate vreg once per nonlinearity, then slice.
        # PyTorch gate order [i, f, g, o].
        sg = jax.nn.sigmoid(gates)
        tg = jnp.tanh(gates)
        i_g = sg[:, 0 * H:1 * H]
        f_g = sg[:, 1 * H:2 * H]
        g_g = tg[:, 2 * H:3 * H]
        o_g = sg[:, 3 * H:4 * H]
        c_new = f_g * c + i_g * g_g
        h_new = o_g * jnp.tanh(c_new)
        hs_ref[pl.ds(row, B), :] = h_new                           # time-major rows
        return (h_new, c_new)

    jax.lax.fori_loop(0, T, step, (h0, c0), unroll=True)

    # ---- deferred fc + softmax over all T*B rows, lane-dense output ----------
    w_fc = fcpk_ref[0:H, :]                # (H, Opad), padded lanes are zeros
    b_fc = fcpk_ref[H:H + 1, :]            # (1, Opad), padded lanes are -1e30
    logits = jnp.dot(hs_ref[...], w_fc,
                     preferred_element_type=jnp.float32) + b_fc    # (T*B, Opad)
    m = jnp.max(logits, axis=-1, keepdims=True)
    e = jnp.exp(logits - m)                # padded columns underflow to exactly 0
    inv = pl.reciprocal(jnp.sum(e, axis=-1, keepdims=True), approx=True)
    out_ref[...] = e * inv


def lstm_model_forward(x, params, *, output_size):
    """x: (B, T, I) batch-first (as in the PyTorch module with batch_first=True).

    Returns (B*T, output_size) with row index b*T + t, matching
    outs.contiguous().view(-1, hidden_dim) -> fc -> softmax in the module.
    """
    B, T, I = x.shape
    H = params["hc0"].shape[1]
    Opad = params["fc_pk"].shape[1]
    BT = B * T

    # Tiny trace-time reorder to time-major rows (t*B + b); fused by XLA.
    x_tm = jnp.transpose(x, (1, 0, 2)).reshape(BT, I)

    probs_tm = pl.pallas_call(
        lstm_fused_kernel,
        out_shape=jax.ShapeDtypeStruct((BT, Opad), jnp.float32),
        grid=(1,),
        in_specs=[
            pl.BlockSpec((BT, I), lambda i: (0, 0)),                   # x, time-major
            pl.BlockSpec(params["w_pk"].shape, lambda i: (0, 0)),      # [W_ih^T; W_hh^T; b]
            pl.BlockSpec(params["hc0"].shape, lambda i: (0, 0)),       # [h0; c0]
            pl.BlockSpec(params["fc_pk"].shape, lambda i: (0, 0)),     # [W_fc^T; b_fc] lane-padded
        ],
        out_specs=pl.BlockSpec((BT, Opad), lambda i: (0, 0)),
        scratch_shapes=[
            pltpu.VMEM((BT, 4 * H), jnp.float32),    # xg (hoisted projection)
            pltpu.VMEM((BT, H), jnp.float32),        # hs (all hidden states)
        ],
        compiler_params=pltpu.CompilerParams(
            dimension_semantics=("arbitrary",)),     # recurrence is serial
    )(x_tm, params["w_pk"], params["hc0"], params["fc_pk"])

    # Time-major (T*B, Opad) -> batch-major (B*T, O); 4 KiB reorder outside kernel.
    out = jnp.transpose(probs_tm.reshape(T, B, Opad), (1, 0, 2)).reshape(BT, Opad)
    return out[:, :output_size]


def make_params(key, input_size, hidden_dim, output_size):
    """Deterministic parameter init mimicking PyTorch's U(-1/sqrt(H), 1/sqrt(H))."""
    keys = jax.random.split(key, 8)
    H = hidden_dim
    I = input_size
    O_PAD = 128
    bound = 1.0 / np.sqrt(H)

    w_ih = jax.random.uniform(keys[0], (4 * H, I), jnp.float32, -bound, bound)
    w_hh = jax.random.uniform(keys[1], (4 * H, H), jnp.float32, -bound, bound)
    b_ih = jax.random.uniform(keys[2], (4 * H,), jnp.float32, -bound, bound)
    b_hh = jax.random.uniform(keys[3], (4 * H,), jnp.float32, -bound, bound)
    w_fc = jax.random.uniform(keys[4], (output_size, H), jnp.float32, -bound, bound)
    b_fc = jax.random.uniform(keys[5], (output_size,), jnp.float32, -bound, bound)

    # The PyTorch module draws torch.randn(1, input_size, hidden_dim) for (h0, c0)
    # on EVERY forward (and uses input_size as the batch dim, so batch==input_size).
    # TODO(synk): per-forward random re-draw of (h0, c0) is not reproduced; a fixed
    # deterministic draw is used instead.
    h0 = jax.random.normal(keys[6], (I, H), jnp.float32)
    c0 = jax.random.normal(keys[7], (I, H), jnp.float32)

    # --- packed gate weights: [W_ih^T; W_hh^T; b_ih+b_hh], sublane-padded --------
    rows = I + H + 1
    rows_pad = int(np.ceil(rows / 8.0) * 8)
    w_pk = np.zeros((rows_pad, 4 * H), np.float32)
    w_pk[0:I] = np.asarray(w_ih).T
    w_pk[I:I + H] = np.asarray(w_hh).T
    w_pk[I + H] = np.asarray(b_ih + b_hh)

    # --- packed initial state: [h0; c0] ------------------------------------------
    hc0 = jnp.concatenate([h0, c0], axis=0)                     # (2B, H)

    # --- packed fc, lane-dense to 128 output columns ------------------------------
    # Padded weight columns are zero; padded bias columns are -1e30 so softmax
    # drives them to exactly 0 (they are sliced off in the wrapper anyway).
    fc_rows = H + 1
    fc_rows_pad = int(np.ceil(fc_rows / 8.0) * 8)
    fc_pk = np.zeros((fc_rows_pad, O_PAD), np.float32)
    fc_pk[0:H, 0:output_size] = np.asarray(w_fc).T
    fc_pk[H, :] = -1e30
    fc_pk[H, 0:output_size] = np.asarray(b_fc)

    return {
        # packed kernel operands
        "w_pk": jnp.asarray(w_pk),                    # (48, 4H)
        "hc0": hc0,                                   # (2B, H)
        "fc_pk": jnp.asarray(fc_pk),                  # (40, 128)
        # unpacked copies for the pure-JAX reference
        "w_ih_t": jnp.transpose(w_ih),                # (I, 4H)
        "w_hh_t": jnp.transpose(w_hh),                # (H, 4H)
        "b_gates": (b_ih + b_hh).reshape(1, 4 * H),   # (1, 4H)
        "w_fc_t": jnp.transpose(w_fc),                # (H, O)
        "b_fc": b_fc.reshape(1, output_size),         # (1, O)
        "h0": h0,                                     # (B, H)
        "c0": c0,                                     # (B, H)
    }


def reference_forward(x, params):
    """Pure-JAX reference of the same forward pass (for validation)."""
    B, T, I = x.shape
    H = params["w_hh_t"].shape[0]

    def step(carry, x_t):
        h, c = carry
        gates = x_t @ params["w_ih_t"] + h @ params["w_hh_t"] + params["b_gates"]
        i_g = jax.nn.sigmoid(gates[:, 0 * H:1 * H])
        f_g = jax.nn.sigmoid(gates[:, 1 * H:2 * H])
        g_g = jnp.tanh(gates[:, 2 * H:3 * H])
        o_g = jax.nn.sigmoid(gates[:, 3 * H:4 * H])
        c_new = f_g * c + i_g * g_g
        h_new = o_g * jnp.tanh(c_new)
        return (h_new, c_new), h_new

    x_tm = jnp.transpose(x, (1, 0, 2))
    (_, _), hs = jax.lax.scan(step, (params["h0"], params["c0"]), x_tm)  # (T, B, H)
    outs = jnp.transpose(hs, (1, 0, 2)).reshape(B * T, H)
    logits = outs @ params["w_fc_t"] + params["b_fc"]
    return jax.nn.softmax(logits, axis=-1)


if __name__ == "__main__":
    # Module quirk: init_hidden() builds (1, input_size, hidden_dim) states, so the
    # effective batch size must equal input_size for nn.LSTM to accept it.
    input_size = 8
    hidden_dim = 32
    output_size = 16
    n_layers = 1          # TODO(synk): only n_layers=1 is implemented (the module's
                          #             init_hidden only supports 1 layer anyway).
    batch = input_size
    seq_len = 8

    key = jax.random.PRNGKey(0)
    k_params, k_x = jax.random.split(key)
    params = make_params(k_params, input_size, hidden_dim, output_size)

    # x: padded batch-first sequences (B, T, I); full lengths, so
    # pack/pad_packed_sequence is semantically an identity here.
    x = jax.random.normal(k_x, (batch, seq_len, input_size), jnp.float32)

    fwd = jax.jit(functools.partial(lstm_model_forward, output_size=output_size))
    out = jax.block_until_ready(fwd(x, params))
    ref = jax.block_until_ready(reference_forward(x, params))

    assert out.shape == (batch * seq_len, output_size)
    # Tolerance loosened vs. exact-division reference because the kernel uses the
    # EUP approximate reciprocal (pl.reciprocal(approx=True)) for the softmax denom.
    np.testing.assert_allclose(np.asarray(out), np.asarray(ref), rtol=2e-3, atol=2e-3)

    print("KERNEL_OK")
</pallas_src>

<mosaic_0001>
module attributes {stable_mosaic.version = 11 : i64} {
  func.func @lstm_fused_kernel(%arg0: i32, %arg1: memref<64x8xf32, #tpu.memory_space<vmem>>, %arg2: memref<48x128xf32, #tpu.memory_space<vmem>>, %arg3: memref<16x32xf32, #tpu.memory_space<vmem>>, %arg4: memref<40x128xf32, #tpu.memory_space<vmem>>, %arg5: memref<64x128xf32, #tpu.memory_space<vmem>>, %arg6: memref<64x128xf32, #tpu.memory_space<vmem>>, %arg7: memref<64x32xf32, #tpu.memory_space<vmem>>) attributes {dimension_semantics = [#tpu.dimension_semantics<arbitrary>], iteration_bounds = array<i64: 1>, scalar_prefetch = 0 : i64, scratch_operands = 2 : i64, tpu.core_type = #tpu.core_type<tc>, window_params = [{pipeline_mode = #tpu.pipeline_mode<synchronous>, transform_indices = @transform_0, window_bounds = array<i64: 64, 8>}, {pipeline_mode = #tpu.pipeline_mode<synchronous>, transform_indices = @transform_1, window_bounds = array<i64: 48, 128>}, {pipeline_mode = #tpu.pipeline_mode<synchronous>, transform_indices = @transform_2, window_bounds = array<i64: 16, 32>}, {pipeline_mode = #tpu.pipeline_mode<synchronous>, transform_indices = @transform_3, window_bounds = array<i64: 40, 128>}, {pipeline_mode = #tpu.pipeline_mode<synchronous>, transform_indices = @transform_4, window_bounds = array<i64: 64, 128>}]} {
    %c0 = arith.constant 0 : index
    %c0_0 = arith.constant 0 : index
    %0 = vector.load %arg2[%c0, %c0_0] : memref<48x128xf32, #tpu.memory_space<vmem>>, vector<8x128xf32>
    %c8 = arith.constant 8 : index
    %c0_1 = arith.constant 0 : index
    %1 = vector.load %arg2[%c8, %c0_1] : memref<48x128xf32, #tpu.memory_space<vmem>>, vector<32x128xf32>
    %c40 = arith.constant 40 : index
    %c0_2 = arith.constant 0 : index
    %2 = vector.load %arg2[%c40, %c0_2] : memref<48x128xf32, #tpu.memory_space<vmem>>, vector<1x128xf32>
    %c0_3 = arith.constant 0 : index
    %c0_4 = arith.constant 0 : index
    %3 = vector.load %arg1[%c0_3, %c0_4] : memref<64x8xf32, #tpu.memory_space<vmem>>, vector<64x8xf32>
    %cst = arith.constant dense<0.000000e+00> : vector<64x128xf32>
    %4 = tpu.matmul %3, %0, %cst {dimension_numbers = #tpu.dot_dimension_numbers<[1], [0], [0], [1], [0, 0, 1, 1], [], []>} : vector<64x8xf32>, vector<8x128xf32>, vector<64x128xf32> -> vector<64x128xf32>
    %5 = vector.broadcast %2 : vector<1x128xf32> to vector<64x128xf32>
    %6 = arith.addf %4, %5 : vector<64x128xf32>
    %c0_5 = arith.constant 0 : index
    %c0_6 = arith.constant 0 : index
    %7 = vector.load %arg6[%c0_5, %c0_6] : memref<64x128xf32, #tpu.memory_space<vmem>>, vector<64x128xf32>
    tpu.vector_store %arg6[%c0_5, %c0_6], %6 {strides = array<i32>} : memref<64x128xf32, #tpu.memory_space<vmem>>, vector<64x128xf32>,
    %c0_7 = arith.constant 0 : index
    %c0_8 = arith.constant 0 : index
    %8 = vector.load %arg3[%c0_7, %c0_8] : memref<16x32xf32, #tpu.memory_space<vmem>>, vector<8x32xf32>
    %c8_9 = arith.constant 8 : index
    %c0_10 = arith.constant 0 : index
    %9 = vector.load %arg3[%c8_9, %c0_10] : memref<16x32xf32, #tpu.memory_space<vmem>>, vector<8x32xf32>
    %c0_i32 = arith.constant 0 : i32
    %c8_i32 = arith.constant 8 : i32
    %10 = arith.muli %c0_i32, %c8_i32 : i32
    %11 = tpu.assume_multiple %10, 8 : i32
    %12 = arith.index_cast %11 : i32 to index
    %c0_11 = arith.constant 0 : index
    %13 = vector.load %arg6[%12, %c0_11] : memref<64x128xf32, #tpu.memory_space<vmem>>, vector<8x128xf32>
    %cst_12 = arith.constant dense<0.000000e+00> : vector<8x128xf32>
    %14 = tpu.matmul %8, %1, %cst_12 {dimension_numbers = #tpu.dot_dimension_numbers<[1], [0], [0], [1], [0, 0, 1, 1], [], []>} : vector<8x32xf32>, vector<32x128xf32>, vector<8x128xf32> -> vector<8x128xf32>
    %15 = arith.addf %13, %14 : vector<8x128xf32>
    %16 = arith.negf %15 : vector<8x128xf32>
    %17 = math.exp %16 : vector<8x128xf32>
    %cst_13 = arith.constant 1.000000e+00 : f32
    %18 = vector.broadcast %cst_13 : f32 to vector<8x128xf32>
    %19 = arith.addf %18, %17 : vector<8x128xf32>
    %20 = arith.divf %18, %19 : vector<8x128xf32>
    %21 = math.tanh %15 : vector<8x128xf32>
    %22 = vector.extract_strided_slice %20 {offsets = [0, 0], sizes = [8, 32], strides = [1, 1]} : vector<8x128xf32> to vector<8x32xf32>
    %23 = vector.extract_strided_slice %20 {offsets = [0, 32], sizes = [8, 32], strides = [1, 1]} : vector<8x128xf32> to vector<8x32xf32>
    %24 = vector.extract_strided_slice %21 {offsets = [0, 64], sizes = [8, 32], strides = [1, 1]} : vector<8x128xf32> to vector<8x32xf32>
    %25 = vector.extract_strided_slice %20 {offsets = [0, 96], sizes = [8, 32], strides = [1, 1]} : vector<8x128xf32> to vector<8x32xf32>
    %26 = arith.mulf %23, %9 : vector<8x32xf32>
    %27 = arith.mulf %22, %24 : vector<8x32xf32>
    %28 = arith.addf %26, %27 : vector<8x32xf32>
    %29 = math.tanh %28 : vector<8x32xf32>
    %30 = arith.mulf %25, %29 : vector<8x32xf32>
    %31 = arith.index_cast %11 : i32 to index
    %c0_14 = arith.constant 0 : index
    %32 = vector.load %arg7[%31, %c0_14] : memref<64x32xf32, #tpu.memory_space<vmem>>, vector<8x32xf32>
    tpu.vector_store %arg7[%31, %c0_14], %30 {strides = array<i32>} : memref<64x32xf32, #tpu.memory_space<vmem>>, vector<8x32xf32>,
    %c1_i32 = arith.constant 1 : i32
    %c8_i32_15 = arith.constant 8 : i32
    %33 = arith.muli %c1_i32, %c8_i32_15 : i32
    %34 = tpu.assume_multiple %33, 8 : i32
    %35 = arith.index_cast %34 : i32 to index
    %c0_16 = arith.constant 0 : index
    %36 = vector.load %arg6[%35, %c0_16] : memref<64x128xf32, #tpu.memory_space<vmem>>, vector<8x128xf32>
    %cst_17 = arith.constant dense<0.000000e+00> : vector<8x128xf32>
    %37 = tpu.matmul %30, %1, %cst_17 {dimension_numbers = #tpu.dot_dimension_numbers<[1], [0], [0], [1], [0, 0, 1, 1], [], []>} : vector<8x32xf32>, vector<32x128xf32>, vector<8x128xf32> -> vector<8x128xf32>
    %38 = arith.addf %36, %37 : vector<8x128xf32>
    %39 = arith.negf %38 : vector<8x128xf32>
    %40 = math.exp %39 : vector<8x128xf32>
    %cst_18 = arith.constant 1.000000e+00 : f32
    %41 = vector.broadcast %cst_18 : f32 to vector<8x128xf32>
    %42 = arith.addf %41, %40 : vector<8x128xf32>
    %43 = arith.divf %41, %42 : vector<8x128xf32>
    %44 = math.tanh %38 : vector<8x128xf32>
    %45 = vector.extract_strided_slice %43 {offsets = [0, 0], sizes = [8, 32], strides = [1, 1]} : vector<8x128xf32> to vector<8x32xf32>
    %46 = vector.extract_strided_slice %43 {offsets = [0, 32], sizes = [8, 32], strides = [1, 1]} : vector<8x128xf32> to vector<8x32xf32>
    %47 = vector.extract_strided_slice %44 {offsets = [0, 64], sizes = [8, 32], strides = [1, 1]} : vector<8x128xf32> to vector<8x32xf32>
    %48 = vector.extract_strided_slice %43 {offsets = [0, 96], sizes = [8, 32], strides = [1, 1]} : vector<8x128xf32> to vector<8x32xf32>
    %49 = arith.mulf %46, %28 : vector<8x32xf32>
    %50 = arith.mulf %45, %47 : vector<8x32xf32>
    %51 = arith.addf %49, %50 : vector<8x32xf32>
    %52 = math.tanh %51 : vector<8x32xf32>
    %53 = arith.mulf %48, %52 : vector<8x32xf32>
    %54 = arith.index_cast %34 : i32 to index
    %c0_19 = arith.constant 0 : index
    %55 = vector.load %arg7[%54, %c0_19] : memref<64x32xf32, #tpu.memory_space<vmem>>, vector<8x32xf32>
    tpu.vector_store %arg7[%54, %c0_19], %53 {strides = array<i32>} : memref<64x32xf32, #tpu.memory_space<vmem>>, vector<8x32xf32>,
    %c2_i32 = arith.constant 2 : i32
    %c8_i32_20 = arith.constant 8 : i32
    %56 = arith.muli %c2_i32, %c8_i32_20 : i32
    %57 = tpu.assume_multiple %56, 8 : i32
    %58 = arith.index_cast %57 : i32 to index
    %c0_21 = arith.constant 0 : index
    %59 = vector.load %arg6[%58, %c0_21] : memref<64x128xf32, #tpu.memory_space<vmem>>, vector<8x128xf32>
    %cst_22 = arith.constant dense<0.000000e+00> : vector<8x128xf32>
    %60 = tpu.matmul %53, %1, %cst_22 {dimension_numbers = #tpu.dot_dimension_numbers<[1], [0], [0], [1], [0, 0, 1, 1], [], []>} : vector<8x32xf32>, vector<32x128xf32>, vector<8x128xf32> -> vector<8x128xf32>
    %61 = arith.addf %59, %60 : vector<8x128xf32>
    %62 = arith.negf %61 : vector<8x128xf32>
    %63 = math.exp %62 : vector<8x128xf32>
    %cst_23 = arith.constant 1.000000e+00 : f32
    %64 = vector.broadcast %cst_23 : f32 to vector<8x128xf32>
    %65 = arith.addf %64, %63 : vector<8x128xf32>
    %66 = arith.divf %64, %65 : vector<8x128xf32>
    %67 = math.tanh %61 : vector<8x128xf32>
    %68 = vector.extract_strided_slice %66 {offsets = [0, 0], sizes = [8, 32], strides = [1, 1]} : vector<8x128xf32> to vector<8x32xf32>
    %69 = vector.extract_strided_slice %66 {offsets = [0, 32], sizes = [8, 32], strides = [1, 1]} : vector<8x128xf32> to vector<8x32xf32>
    %70 = vector.extract_strided_slice %67 {offsets = [0, 64], sizes = [8, 32], strides = [1, 1]} : vector<8x128xf32> to vector<8x32xf32>
    %71 = vector.extract_strided_slice %66 {offsets = [0, 96], sizes = [8, 32], strides = [1, 1]} : vector<8x128xf32> to vector<8x32xf32>
    %72 = arith.mulf %69, %51 : vector<8x32xf32>
    %73 = arith.mulf %68, %70 : vector<8x32xf32>
    %74 = arith.addf %72, %73 : vector<8x32xf32>
    %75 = math.tanh %74 : vector<8x32xf32>
    %76 = arith.mulf %71, %75 : vector<8x32xf32>
    %77 = arith.index_cast %57 : i32 to index
    %c0_24 = arith.constant 0 : index
    %78 = vector.load %arg7[%77, %c0_24] : memref<64x32xf32, #tpu.memory_space<vmem>>, vector<8x32xf32>
    tpu.vector_store %arg7[%77, %c0_24], %76 {strides = array<i32>} : memref<64x32xf32, #tpu.memory_space<vmem>>, vector<8x32xf32>,
    %c3_i32 = arith.constant 3 : i32
    %c8_i32_25 = arith.constant 8 : i32
    %79 = arith.muli %c3_i32, %c8_i32_25 : i32
    %80 = tpu.assume_multiple %79, 8 : i32
    %81 = arith.index_cast %80 : i32 to index
    %c0_26 = arith.constant 0 : index
    %82 = vector.load %arg6[%81, %c0_26] : memref<64x128xf32, #tpu.memory_space<vmem>>, vector<8x128xf32>
    %cst_27 = arith.constant dense<0.000000e+00> : vector<8x128xf32>
    %83 = tpu.matmul %76, %1, %cst_27 {dimension_numbers = #tpu.dot_dimension_numbers<[1], [0], [0], [1], [0, 0, 1, 1], [], []>} : vector<8x32xf32>, vector<32x128xf32>, vector<8x128xf32> -> vector<8x128xf32>
    %84 = arith.addf %82, %83 : vector<8x128xf32>
    %85 = arith.negf %84 : vector<8x128xf32>
    %86 = math.exp %85 : vector<8x128xf32>
    %cst_28 = arith.constant 1.000000e+00 : f32
    %87 = vector.broadcast %cst_28 : f32 to vector<8x128xf32>
    %88 = arith.addf %87, %86 : vector<8x128xf32>
    %89 = arith.divf %87, %88 : vector<8x128xf32>
    %90 = math.tanh %84 : vector<8x128xf32>
    %91 = vector.extract_strided_slice %89 {offsets = [0, 0], sizes = [8, 32], strides = [1, 1]} : vector<8x128xf32> to vector<8x32xf32>
    %92 = vector.extract_strided_slice %89 {offsets = [0, 32], sizes = [8, 32], strides = [1, 1]} : vector<8x128xf32> to vector<8x32xf32>
    %93 = vector.extract_strided_slice %90 {offsets = [0, 64], sizes = [8, 32], strides = [1, 1]} : vector<8x128xf32> to vector<8x32xf32>
    %94 = vector.extract_strided_slice %89 {offsets = [0, 96], sizes = [8, 32], strides = [1, 1]} : vector<8x128xf32> to vector<8x32xf32>
    %95 = arith.mulf %92, %74 : vector<8x32xf32>
    %96 = arith.mulf %91, %93 : vector<8x32xf32>
    %97 = arith.addf %95, %96 : vector<8x32xf32>
    %98 = math.tanh %97 : vector<8x32xf32>
    %99 = arith.mulf %94, %98 : vector<8x32xf32>
    %100 = arith.index_cast %80 : i32 to index
    %c0_29 = arith.constant 0 : index
    %101 = vector.load %arg7[%100, %c0_29] : memref<64x32xf32, #tpu.memory_space<vmem>>, vector<8x32xf32>
    tpu.vector_store %arg7[%100, %c0_29], %99 {strides = array<i32>} : memref<64x32xf32, #tpu.memory_space<vmem>>, vector<8x32xf32>,
    %c4_i32 = arith.constant 4 : i32
    %c8_i32_30 = arith.constant 8 : i32
    %102 = arith.muli %c4_i32, %c8_i32_30 : i32
    %103 = tpu.assume_multiple %102, 8 : i32
    %104 = arith.index_cast %103 : i32 to index
    %c0_31 = arith.constant 0 : index
    %105 = vector.load %arg6[%104, %c0_31] : memref<64x128xf32, #tpu.memory_space<vmem>>, vector<8x128xf32>
    %cst_32 = arith.constant dense<0.000000e+00> : vector<8x128xf32>
    %106 = tpu.matmul %99, %1, %cst_32 {dimension_numbers = #tpu.dot_dimension_numbers<[1], [0], [0], [1], [0, 0, 1, 1], [], []>} : vector<8x32xf32>, vector<32x128xf32>, vector<8x128xf32> -> vector<8x128xf32>
    %107 = arith.addf %105, %106 : vector<8x128xf32>
    %108 = arith.negf %107 : vector<8x128xf32>
    %109 = math.exp %108 : vector<8x128xf32>
    %cst_33 = arith.constant 1.000000e+00 : f32
    %110 = vector.broadcast %cst_33 : f32 to vector<8x128xf32>
    %111 = arith.addf %110, %109 : vector<8x128xf32>
    %112 = arith.divf %110, %111 : vector<8x128xf32>
    %113 = math.tanh %107 : vector<8x128xf32>
    %114 = vector.extract_strided_slice %112 {offsets = [0, 0], sizes = [8, 32], strides = [1, 1]} : vector<8x128xf32> to vector<8x32xf32>
    %115 = vector.extract_strided_slice %112 {offsets = [0, 32], sizes = [8, 32], strides = [1, 1]} : vector<8x128xf32> to vector<8x32xf32>
    %116 = vector.extract_strided_slice %113 {offsets = [0, 64], sizes = [8, 32], strides = [1, 1]} : vector<8x128xf32> to vector<8x32xf32>
    %117 = vector.extract_strided_slice %112 {offsets = [0, 96], sizes = [8, 32], strides = [1, 1]} : vector<8x128xf32> to vector<8x32xf32>
    %118 = arith.mulf %115, %97 : vector<8x32xf32>
    %119 = arith.mulf %114, %116 : vector<8x32xf32>
    %120 = arith.addf %118, %119 : vector<8x32xf32>
    %121 = math.tanh %120 : vector<8x32xf32>
    %122 = arith.mulf %117, %121 : vector<8x32xf32>
    %123 = arith.index_cast %103 : i32 to index
    %c0_34 = arith.constant 0 : index
    %124 = vector.load %arg7[%123, %c0_34] : memref<64x32xf32, #tpu.memory_space<vmem>>, vector<8x32xf32>
    tpu.vector_store %arg7[%123, %c0_34], %122 {strides = array<i32>} : memref<64x32xf32, #tpu.memory_space<vmem>>, vector<8x32xf32>,
    %c5_i32 = arith.constant 5 : i32
    %c8_i32_35 = arith.constant 8 : i32
    %125 = arith.muli %c5_i32, %c8_i32_35 : i32
    %126 = tpu.assume_multiple %125, 8 : i32
    %127 = arith.index_cast %126 : i32 to index
    %c0_36 = arith.constant 0 : index
    %128 = vector.load %arg6[%127, %c0_36] : memref<64x128xf32, #tpu.memory_space<vmem>>, vector<8x128xf32>
    %cst_37 = arith.constant dense<0.000000e+00> : vector<8x128xf32>
    %129 = tpu.matmul %122, %1, %cst_37 {dimension_numbers = #tpu.dot_dimension_numbers<[1], [0], [0], [1], [0, 0, 1, 1], [], []>} : vector<8x32xf32>, vector<32x128xf32>, vector<8x128xf32> -> vector<8x128xf32>
    %130 = arith.addf %128, %129 : vector<8x128xf32>
    %131 = arith.negf %130 : vector<8x128xf32>
    %132 = math.exp %131 : vector<8x128xf32>
    %cst_38 = arith.constant 1.000000e+00 : f32
    %133 = vector.broadcast %cst_38 : f32 to vector<8x128xf32>
    %134 = arith.addf %133, %132 : vector<8x128xf32>
    %135 = arith.divf %133, %134 : vector<8x128xf32>
    %136 = math.tanh %130 : vector<8x128xf32>
    %137 = vector.extract_strided_slice %135 {offsets = [0, 0], sizes = [8, 32], strides = [1, 1]} : vector<8x128xf32> to vector<8x32xf32>
    %138 = vector.extract_strided_slice %135 {offsets = [0, 32], sizes = [8, 32], strides = [1, 1]} : vector<8x128xf32> to vector<8x32xf32>
    %139 = vector.extract_strided_slice %136 {offsets = [0, 64], sizes = [8, 32], strides = [1, 1]} : vector<8x128xf32> to vector<8x32xf32>
    %140 = vector.extract_strided_slice %135 {offsets = [0, 96], sizes = [8, 32], strides = [1, 1]} : vector<8x128xf32> to vector<8x32xf32>
    %141 = arith.mulf %138, %120 : vector<8x32xf32>
    %142 = arith.mulf %137, %139 : vector<8x32xf32>
    %143 = arith.addf %141, %142 : vector<8x32xf32>
    %144 = math.tanh %143 : vector<8x32xf32>
    %145 = arith.mulf %140, %144 : vector<8x32xf32>
    %146 = arith.index_cast %126 : i32 to index
    %c0_39 = arith.constant 0 : index
    %147 = vector.load %arg7[%146, %c0_39] : memref<64x32xf32, #tpu.memory_space<vmem>>, vector<8x32xf32>
    tpu.vector_store %arg7[%146, %c0_39], %145 {strides = array<i32>} : memref<64x32xf32, #tpu.memory_space<vmem>>, vector<8x32xf32>,
    %c6_i32 = arith.constant 6 : i32
    %c8_i32_40 = arith.constant 8 : i32
    %148 = arith.muli %c6_i32, %c8_i32_40 : i32
    %149 = tpu.assume_multiple %148, 8 : i32
    %150 = arith.index_cast %149 : i32 to index
    %c0_41 = arith.constant 0 : index
    %151 = vector.load %arg6[%150, %c0_41] : memref<64x128xf32, #tpu.memory_space<vmem>>, vector<8x128xf32>
    %cst_42 = arith.constant dense<0.000000e+00> : vector<8x128xf32>
    %152 = tpu.matmul %145, %1, %cst_42 {dimension_numbers = #tpu.dot_dimension_numbers<[1], [0], [0], [1], [0, 0, 1, 1], [], []>} : vector<8x32xf32>, vector<32x128xf32>, vector<8x128xf32> -> vector<8x128xf32>
    %153 = arith.addf %151, %152 : vector<8x128xf32>
    %154 = arith.negf %153 : vector<8x128xf32>
    %155 = math.exp %154 : vector<8x128xf32>
    %cst_43 = arith.constant 1.000000e+00 : f32
    %156 = vector.broadcast %cst_43 : f32 to vector<8x128xf32>
    %157 = arith.addf %156, %155 : vector<8x128xf32>
    %158 = arith.divf %156, %157 : vector<8x128xf32>
    %159 = math.tanh %153 : vector<8x128xf32>
    %160 = vector.extract_strided_slice %158 {offsets = [0, 0], sizes = [8, 32], strides = [1, 1]} : vector<8x128xf32> to vector<8x32xf32>
    %161 = vector.extract_strided_slice %158 {offsets = [0, 32], sizes = [8, 32], strides = [1, 1]} : vector<8x128xf32> to vector<8x32xf32>
    %162 = vector.extract_strided_slice %159 {offsets = [0, 64], sizes = [8, 32], strides = [1, 1]} : vector<8x128xf32> to vector<8x32xf32>
    %163 = vector.extract_strided_slice %158 {offsets = [0, 96], sizes = [8, 32], strides = [1, 1]} : vector<8x128xf32> to vector<8x32xf32>
    %164 = arith.mulf %161, %143 : vector<8x32xf32>
    %165 = arith.mulf %160, %162 : vector<8x32xf32>
    %166 = arith.addf %164, %165 : vector<8x32xf32>
    %167 = math.tanh %166 : vector<8x32xf32>
    %168 = arith.mulf %163, %167 : vector<8x32xf32>
    %169 = arith.index_cast %149 : i32 to index
    %c0_44 = arith.constant 0 : index
    %170 = vector.load %arg7[%169, %c0_44] : memref<64x32xf32, #tpu.memory_space<vmem>>, vector<8x32xf32>
    tpu.vector_store %arg7[%169, %c0_44], %168 {strides = array<i32>} : memref<64x32xf32, #tpu.memory_space<vmem>>, vector<8x32xf32>,
    %c7_i32 = arith.constant 7 : i32
    %c8_i32_45 = arith.constant 8 : i32
    %171 = arith.muli %c7_i32, %c8_i32_45 : i32
    %172 = tpu.assume_multiple %171, 8 : i32
    %173 = arith.index_cast %172 : i32 to index
    %c0_46 = arith.constant 0 : index
    %174 = vector.load %arg6[%173, %c0_46] : memref<64x128xf32, #tpu.memory_space<vmem>>, vector<8x128xf32>
    %cst_47 = arith.constant dense<0.000000e+00> : vector<8x128xf32>
    %175 = tpu.matmul %168, %1, %cst_47 {dimension_numbers = #tpu.dot_dimension_numbers<[1], [0], [0], [1], [0, 0, 1, 1], [], []>} : vector<8x32xf32>, vector<32x128xf32>, vector<8x128xf32> -> vector<8x128xf32>
    %176 = arith.addf %174, %175 : vector<8x128xf32>
    %177 = arith.negf %176 : vector<8x128xf32>
    %178 = math.exp %177 : vector<8x128xf32>
    %cst_48 = arith.constant 1.000000e+00 : f32
    %179 = vector.broadcast %cst_48 : f32 to vector<8x128xf32>
    %180 = arith.addf %179, %178 : vector<8x128xf32>
    %181 = arith.divf %179, %180 : vector<8x128xf32>
    %182 = math.tanh %176 : vector<8x128xf32>
    %183 = vector.extract_strided_slice %181 {offsets = [0, 0], sizes = [8, 32], strides = [1, 1]} : vector<8x128xf32> to vector<8x32xf32>
    %184 = vector.extract_strided_slice %181 {offsets = [0, 32], sizes = [8, 32], strides = [1, 1]} : vector<8x128xf32> to vector<8x32xf32>
    %185 = vector.extract_strided_slice %182 {offsets = [0, 64], sizes = [8, 32], strides = [1, 1]} : vector<8x128xf32> to vector<8x32xf32>
    %186 = vector.extract_strided_slice %181 {offsets = [0, 96], sizes = [8, 32], strides = [1, 1]} : vector<8x128xf32> to vector<8x32xf32>
    %187 = arith.mulf %184, %166 : vector<8x32xf32>
    %188 = arith.mulf %183, %185 : vector<8x32xf32>
    %189 = arith.addf %187, %188 : vector<8x32xf32>
    %190 = math.tanh %189 : vector<8x32xf32>
    %191 = arith.mulf %186, %190 : vector<8x32xf32>
    %192 = arith.index_cast %172 : i32 to index
    %c0_49 = arith.constant 0 : index
    %193 = vector.load %arg7[%192, %c0_49] : memref<64x32xf32, #tpu.memory_space<vmem>>, vector<8x32xf32>
    tpu.vector_store %arg7[%192, %c0_49], %191 {strides = array<i32>} : memref<64x32xf32, #tpu.memory_space<vmem>>, vector<8x32xf32>,
    %c8_i32_50 = arith.constant 8 : i32
    %c0_51 = arith.constant 0 : index
    %c0_52 = arith.constant 0 : index
    %194 = vector.load %arg4[%c0_51, %c0_52] : memref<40x128xf32, #tpu.memory_space<vmem>>, vector<32x128xf32>
    %c32 = arith.constant 32 : index
    %c0_53 = arith.constant 0 : index
    %195 = vector.load %arg4[%c32, %c0_53] : memref<40x128xf32, #tpu.memory_space<vmem>>, vector<1x128xf32>
    %c0_54 = arith.constant 0 : index
    %c0_55 = arith.constant 0 : index
    %196 = vector.load %arg7[%c0_54, %c0_55] : memref<64x32xf32, #tpu.memory_space<vmem>>, vector<64x32xf32>
    %cst_56 = arith.constant dense<0.000000e+00> : vector<64x128xf32>
    %197 = tpu.matmul %196, %194, %cst_56 {dimension_numbers = #tpu.dot_dimension_numbers<[1], [0], [0], [1], [0, 0, 1, 1], [], []>} : vector<64x32xf32>, vector<32x128xf32>, vector<64x128xf32> -> vector<64x128xf32>
    %198 = vector.broadcast %195 : vector<1x128xf32> to vector<64x128xf32>
    %199 = arith.addf %197, %198 : vector<64x128xf32>
    %cst_57 = arith.constant dense<0xFF800000> : vector<64xf32>
    %200 = vector.multi_reduction <maximumf>, %199, %cst_57 [1] : vector<64x128xf32> to vector<64xf32>
    %201 = vector.shape_cast %200 : vector<64xf32> to vector<64x1xf32>
    %202 = vector.broadcast %201 : vector<64x1xf32> to vector<64x128xf32>
    %203 = arith.subf %199, %202 : vector<64x128xf32>
    %204 = math.exp %203 : vector<64x128xf32>
    %cst_58 = arith.constant dense<0.000000e+00> : vector<64xf32>
    %205 = vector.multi_reduction <add>, %204, %cst_58 [1] : vector<64x128xf32> to vector<64xf32>
    %206 = vector.shape_cast %205 : vector<64xf32> to vector<64x1xf32>
    %207 = tpu.reciprocal %206 {approx = true} : vector<64x1xf32> -> vector<64x1xf32>
    %208 = vector.broadcast %207 : vector<64x1xf32> to vector<64x128xf32>
    %209 = arith.mulf %204, %208 : vector<64x128xf32>
    %c0_59 = arith.constant 0 : index
    %c0_60 = arith.constant 0 : index
    %210 = vector.load %arg5[%c0_59, %c0_60] : memref<64x128xf32, #tpu.memory_space<vmem>>, vector<64x128xf32>
    tpu.vector_store %arg5[%c0_59, %c0_60], %209 {strides = array<i32>} : memref<64x128xf32, #tpu.memory_space<vmem>>, vector<64x128xf32>,
    return
  }
  func.func @transform_0(%arg0: i32) -> (i32, i32) {
    %c0_i32 = arith.constant 0 : i32
    %c0_i32_0 = arith.constant 0 : i32
    %c0_i32_1 = arith.constant 0 : i32
    return %c0_i32, %c0_i32_0 : i32, i32
  }
  func.func @transform_1(%arg0: i32) -> (i32, i32) {
    %c0_i32 = arith.constant 0 : i32
    %c0_i32_0 = arith.constant 0 : i32
    %c0_i32_1 = arith.constant 0 : i32
    return %c0_i32, %c0_i32_0 : i32, i32
  }
  func.func @transform_2(%arg0: i32) -> (i32, i32) {
    %c0_i32 = arith.constant 0 : i32
    %c0_i32_0 = arith.constant 0 : i32
    %c0_i32_1 = arith.constant 0 : i32
    return %c0_i32, %c0_i32_0 : i32, i32
  }
  func.func @transform_3(%arg0: i32) -> (i32, i32) {
    %c0_i32 = arith.constant 0 : i32
    %c0_i32_0 = arith.constant 0 : i32
    %c0_i32_1 = arith.constant 0 : i32
    return %c0_i32, %c0_i32_0 : i32, i32
  }
  func.func @transform_4(%arg0: i32) -> (i32, i32) {
    %c0_i32 = arith.constant 0 : i32
    %c0_i32_0 = arith.constant 0 : i32
    %c0_i32_1 = arith.constant 0 : i32
    return %c0_i32, %c0_i32_0 : i32, i32
  }
}

</mosaic_0001>

<bundles_post_ra>
// kernel: lstm_model_forward.1
= control target key start
LH: loop header
LB: loop body
LE: loop exit
PB: predicated region body
PF: predicated region fallthrough
CT: control target
= control target key end

     0   :  { %vm32_vm0 = vcmask 64512   ;;  %vm109_vm1 = vcmask 261120   ;;  %s956_s7 = smov 64   ;;  %s957_s10 = smov 32   ;;  %s1202_s1 = inlined_call_operand.vmem [shape: f32[48,128], index: 1, kind: input, shape index: {}]   ;;  %s1203_s0 = inlined_call_operand.vmem [shape: f32[64,8], index: 0, kind: input, shape index: {}]   ;;  %s1204_s2 = inlined_call_operand.vmem [shape: f32[16,32], index: 2, kind: input, shape index: {}]   ;;  %s1205_s3 = inlined_call_operand.vmem [shape: f32[40,128], index: 3, kind: input, shape index: {}]   ;;  %s1206_s4 = inlined_call_operand.vmem [shape: f32[64,128], index: 4, kind: output, shape index: {}]  }
   0x1   :  { %v17_v0 = vld [vmem:[%s1202_s1] sm:$0xff]  ;;  %v30_v1 = vld [vmem:[%s1203_s0 + $0x38] sm:$0xff]  ;;  %v1009_v5 = vld [vmem:[%s1202_s1 + $0x10] sm:$0xff] }
   0x2   :  { %851 = vmatpush.msra.mxu2 %v17_v0  ;;  %v992_v2 = vld [vmem:[%s1202_s1 + $0x20] sm:$0xff]  ;;  %72 = vmatpush.msra.mxu0 %v17_v0  ;;  %v998_v3 = vld [vmem:[%s1202_s1 + $0x18] sm:$0xff]  ;;  %v1018_v6 = vld [vmem:[%s1202_s1 + $0x8] sm:$0xff] }
   0x3   :  { %826 = vmatmul.msk.f32.vlgmr.msra.gmra.mxu2 %vm32_vm0, %v30_v1  ;;  %264 = vmatpush.msra.mxu3 %v992_v2  ;;  %v23_v4 = vld [vmem:[%s1203_s0] sm:$0xff]  ;;  %v1051_v10 = vld [vmem:[%s1202_s1 + $0x28] ss:$0 sm:$0xff] }
   0x4   :  { %125 = vmatpush.msrb.mxu2 %v992_v2  ;;  %332 = vmatpush.msra.mxu1 %v992_v2  ;;  %v106_v7 = vld [vmem:[%s1204_s2] sm:$0xff]  ;;  %v107_v15 = vld [vmem:[%s1204_s2 + $0x8] sm:$0xff] }
   0x5   :  { %819 = vmatmul.msk.f32.vlgmr.msra.gmra.mxu0 %vm32_vm0, %v23_v4  ;;  %265 = vmatpush.msra.mxu3 %v998_v3  ;;  %v24_v38 = vld [vmem:[%s1203_s0 + $0x8] sm:$0xff] }
   0x6   :  { %126 = vmatpush.msrb.mxu2 %v998_v3  ;;  %333 = vmatpush.msra.mxu1 %v998_v3 }
   0x7   :  { %266 = vmatpush.msra.mxu3 %v1009_v5 }
   0x8   :  { %127 = vmatpush.msrb.mxu2 %v1009_v5  ;;  %334 = vmatpush.msra.mxu1 %v1009_v5 }
   0x9   :  { %267 = vmatpush.msra.mxu3 %v1018_v6 }
   0xa   :  { %128 = vmatpush.msrb.mxu2 %v1018_v6  ;;  %335 = vmatpush.msra.mxu1 %v1018_v6 }
   0xb   :  { %827 = vmatmul.msk.f32.vlgmr.msrb.gmra.mxu2 %vm109_vm1, %v106_v7  ;;  %468 = vmatpush.msrb.mxu3 %v992_v2 }
   0xc   :  { %196 = vmatpush.msra.mxu2 %v992_v2  ;;  %536 = vmatpush.msrb.mxu1 %v992_v2 }
   0xd   :  { %469 = vmatpush.msrb.mxu3 %v998_v3  ;;  %820 = vmatmul.msk.f32.gmra.mxu0 %vm32_vm0, %v24_v38 }
   0xe   :  { %197 = vmatpush.msra.mxu2 %v998_v3  ;;  %537 = vmatpush.msrb.mxu1 %v998_v3 }
   0xf   :  { %470 = vmatpush.msrb.mxu3 %v1009_v5 }
  0x10   :  { %198 = vmatpush.msra.mxu2 %v1009_v5  ;;  %538 = vmatpush.msrb.mxu1 %v1009_v5 }
  0x11   :  { %471 = vmatpush.msrb.mxu3 %v1018_v6 }
  0x12   :  { %199 = vmatpush.msra.mxu2 %v1018_v6  ;;  %539 = vmatpush.msrb.mxu1 %v1018_v6 }
  0x14   :  { %400 = vmatpush.msrb.mxu2 %v992_v2 }
  0x16   :  { %401 = vmatpush.msrb.mxu2 %v998_v3 }
  0x18   :  { %402 = vmatpush.msrb.mxu2 %v1009_v5 }
  0x1a   :  { %403 = vmatpush.msrb.mxu2 %v1018_v6 }
  0x82   :  { %v74_v9 = vpop.f32.mrf.mxu0 }
  0x83   :  { %v75_v11 = vadd.f32 %v1051_v10, %v74_v9 }
  0x86   :  { %v1046_v8 = vpop.f32.mrf.mxu2 }
  0x8a   :  { %v77_v40 = vpop.f32.mrf.mxu0 }
  0x8b   :  { %v78_v41 = vadd.f32 %v1051_v10, %v77_v40 }
  0x8e   :  { %v130_v12 = vpop.f32.mrf.mxu2 }
  0x8f   :  { %v133_v13 = vadd.f32 %v130_v12, %v75_v11 }
  0x91   :  { %860 = vtanh.f32 %v133_v13  ;;  %v828_v16 = vmul.f32 -1.442695, %v133_v13 }
  0x93   :  { %862 = vpow2.f32 %v828_v16 }
  0x97   :  { %v861_v14 = vpop.eup %860 }
  0x98   :  { %160 = vrot.lane.b32.xlu0 %v861_v14, %s956_s7 }
  0x99   :  { %v863_v17 = vpop.eup %862 }
  0x9a   :  { %v137_v18 = vadd.f32 1.0, %v863_v17 }
  0x9c   :  { %864 = vrcp.f32 %v137_v18  ;;  %v149_v24 = vand.u32 2147483648, %v137_v18  ;;  %vm143_vm3 = vweird.f32 %v137_v18  ;;  %v147_v25 = vand.u32 2147483647, %v137_v18 }
  0x9e   :  { %v150_v27 = vor.u32 1.1754944e-38, %v149_v24  ;;  %vm148_vm5 = vcmp.eq.f32.partialorder %v147_v25, 8.507059e+37 }
  0xa0   :  { %155 = vrot.lane.b32.xlu0 %v107_v15, %s957_s10 }
  0xa2   :  { %v865_v19 = vpop.eup %864 }
  0xa3   :  { %v139_v20 = vmul.f32 %v865_v19, %v137_v18  ;;  %vm144_vm2 = vweird.f32 %v865_v19 }
  0xa4   :  { %vm145_vm4 = vmor %vm143_vm3, %vm144_vm2 }
  0xa5   :  { %v140_v21 = vsub.f32 1.0, %v139_v20 }
  0xa7   :  { %v141_v22 = vmul.f32 %v865_v19, %v140_v21 }
  0xa9   :  { %v142_v23 = vadd.f32 %v865_v19, %v141_v22 }
  0xab   :  { %v146_v26 = vsel %vm145_vm4, %v865_v19, %v142_v23 }
  0xac   :  { %v151_v29 = vsel %vm148_vm5, %v150_v27, %v146_v26 }
 0x10a   :  { %v161_v28 = vpop.permute.xlu0 %160 }
 0x10b   :  { %v163_v30 = vmul.f32 %v161_v28, %v151_v29 }
 0x10d   :  { %165 = vrot.lane.b32.xlu1 %v163_v30, %s957_s10  ;;  %v26_v30 = vld [vmem:[%s1203_s0 + $0x18] sm:$0xff] }
 0x112   :  { %v156_v31 = vpop.permute.xlu0 %155 }
 0x113   :  { %v158_v32 = vmul.f32 %v156_v31, %v151_v29 }
 0x17f   :  { %v166_v33 = vpop.permute.xlu1 %165 }
 0x180   :  { %v168_v34 = vadd.f32 %v166_v33, %v158_v32 }
 0x182   :  { %866 = vtanh.f32 %v168_v34 }
 0x188   :  { %v867_v35 = vpop.eup %866 }
 0x189   :  { %171 = vrot.lane.b32.xlu1 %v867_v35, %s956_s7 }
 0x1fb   :  { %v172_v36 = vpop.permute.xlu1 %171 }
 0x1fc   :  { %v174_v37 = vmul.f32 %v172_v36, %v151_v29 }
 0x1fe   :  { %176 = vrot.lane.b32.xlu2 %v174_v37, %s957_s10 }
 0x258   :  { %v177_v39 = vpop.permute.xlu2 %176 }
 0x259   :  { %179 = vst.msk [vmem:[#allocation3] sm:$0xff] %vm109_vm1, %v177_v39  ;;  %829 = vmatmul.msk.f32.vlgmr.msra.gmra.mxu2 %vm109_vm1, %v177_v39 }
 0x25a   :  { %604 = vmatpush.msra.mxu2 %v992_v2  ;;  %v25_v2 = vld [vmem:[%s1203_s0 + $0x10] sm:$0xff] }
 0x25b   :  { %821 = vmatmul.msk.f32.gmra.mxu0 %vm32_vm0, %v25_v2 }
 0x25c   :  { %605 = vmatpush.msra.mxu2 %v998_v3 }
 0x25e   :  { %606 = vmatpush.msra.mxu2 %v1009_v5 }
 0x260   :  { %607 = vmatpush.msra.mxu2 %v1018_v6 }
 0x263   :  { %822 = vmatmul.msk.f32.gmra.mxu0 %vm32_vm0, %v26_v30  ;;  %v656_v30 = vld [vmem:[%s1205_s3] sm:$0xff] }
 0x2d8   :  { %v80_v4 = vpop.f32.mrf.mxu0 }
 0x2d9   :  { %v81_v5 = vadd.f32 %v1051_v10, %v80_v4 }
 0x2dc   :  { %v201_v42 = vpop.f32.mrf.mxu2 }
 0x2dd   :  { %v204_v43 = vadd.f32 %v201_v42, %v78_v41 }
 0x2df   :  { %868 = vtanh.f32 %v204_v43  ;;  %v830_v45 = vmul.f32 -1.442695, %v204_v43 }
 0x2e1   :  { %870 = vpow2.f32 %v830_v45 }
 0x2e5   :  { %v869_v44 = vpop.eup %868 }
 0x2e6   :  { %227 = vrot.lane.b32.xlu2 %v869_v44, %s956_s7 }
 0x2e7   :  { %v871_v46 = vpop.eup %870 }
 0x2e8   :  { %v208_v47 = vadd.f32 1.0, %v871_v46 }
 0x2ea   :  { %872 = vrcp.f32 %v208_v47  ;;  %v220_v53 = vand.u32 2147483648, %v208_v47  ;;  %vm214_vm7 = vweird.f32 %v208_v47  ;;  %v218_v54 = vand.u32 2147483647, %v208_v47 }
 0x2ec   :  { %v221_v56 = vor.u32 1.1754944e-38, %v220_v53  ;;  %vm219_vm9 = vcmp.eq.f32.partialorder %v218_v54, 8.507059e+37 }
 0x2f0   :  { %v873_v48 = vpop.eup %872 }
 0x2f1   :  { %v210_v49 = vmul.f32 %v873_v48, %v208_v47  ;;  %vm215_vm6 = vweird.f32 %v873_v48 }
 0x2f2   :  { %vm216_vm8 = vmor %vm214_vm7, %vm215_vm6 }
 0x2f3   :  { %v211_v50 = vsub.f32 1.0, %v210_v49 }
 0x2f5   :  { %v212_v51 = vmul.f32 %v873_v48, %v211_v50 }
 0x2f7   :  { %v213_v52 = vadd.f32 %v873_v48, %v212_v51 }
 0x2f9   :  { %v217_v55 = vsel %vm216_vm8, %v873_v48, %v213_v52 }
 0x2fa   :  { %v222_v58 = vsel %vm219_vm9, %v221_v56, %v217_v55 }
 0x2fb   :  { %v225_v60 = vmul.f32 %v222_v58, %v168_v34  ;;  %v83_v34 = vpop.f32.mrf.mxu0 }
 0x2fc   :  { %v84_v35 = vadd.f32 %v1051_v10, %v83_v34 }
 0x340   :  { %v228_v57 = vpop.permute.xlu2 %227 }
 0x341   :  { %v230_v59 = vmul.f32 %v228_v57, %v222_v58 }
 0x343   :  { %232 = vrot.lane.b32.xlu0 %v230_v59, %s957_s10 }
 0x3b5   :  { %v233_v61 = vpop.permute.xlu0 %232 }
 0x3b6   :  { %v235_v62 = vadd.f32 %v233_v61, %v225_v60  ;;  %v27_v60 = vld [vmem:[%s1203_s0 + $0x20] sm:$0xff] }
 0x3b7   :  { %823 = vmatmul.msk.f32.gmra.mxu0 %vm32_vm0, %v27_v60 }
 0x3b8   :  { %874 = vtanh.f32 %v235_v62 }
 0x3be   :  { %v875_v63 = vpop.eup %874 }
 0x3bf   :  { %238 = vrot.lane.b32.xlu1 %v875_v63, %s956_s7 }
 0x431   :  { %v239_v0 = vpop.permute.xlu1 %238 }
 0x432   :  { %v241_v1 = vmul.f32 %v239_v0, %v222_v58 }
 0x434   :  { %243 = vrot.lane.b32.xlu2 %v241_v1, %s957_s10 }
 0x48e   :  { %v244_v3 = vpop.permute.xlu2 %243 }
 0x48f   :  { %247 = vst.msk [vmem:[#allocation3 + $0x8] sm:$0xff] %vm109_vm1, %v244_v3  ;;  %831 = vmatmul.msk.f32.vlgmr.msra.gmra.mxu3 %vm109_vm1, %v244_v3 }
 0x512   :  { %v269_v6 = vpop.f32.mrf.mxu3 }
 0x513   :  { %v272_v7 = vadd.f32 %v269_v6, %v81_v5 }
 0x515   :  { %876 = vtanh.f32 %v272_v7  ;;  %v832_v11 = vmul.f32 -1.442695, %v272_v7 }
 0x517   :  { %878 = vpow2.f32 %v832_v11 }
 0x51b   :  { %v877_v9 = vpop.eup %876 }
 0x51c   :  { %295 = vrot.lane.b32.xlu0 %v877_v9, %s956_s7 }
 0x51d   :  { %v879_v12 = vpop.eup %878 }
 0x51e   :  { %v276_v13 = vadd.f32 1.0, %v879_v12 }
 0x520   :  { %880 = vrcp.f32 %v276_v13  ;;  %v288_v19 = vand.u32 2147483648, %v276_v13  ;;  %vm282_vm11 = vweird.f32 %v276_v13  ;;  %v286_v20 = vand.u32 2147483647, %v276_v13 }
 0x522   :  { %v289_v22 = vor.u32 1.1754944e-38, %v288_v19  ;;  %vm287_vm13 = vcmp.eq.f32.partialorder %v286_v20, 8.507059e+37 }
 0x526   :  { %v881_v14 = vpop.eup %880 }
 0x527   :  { %v278_v15 = vmul.f32 %v881_v14, %v276_v13  ;;  %vm283_vm10 = vweird.f32 %v881_v14 }
 0x528   :  { %vm284_vm12 = vmor %vm282_vm11, %vm283_vm10 }
 0x529   :  { %v279_v16 = vsub.f32 1.0, %v278_v15 }
 0x52b   :  { %v280_v17 = vmul.f32 %v881_v14, %v279_v16 }
 0x52d   :  { %v281_v18 = vadd.f32 %v881_v14, %v280_v17 }
 0x52f   :  { %v285_v21 = vsel %vm284_vm12, %v881_v14, %v281_v18 }
 0x530   :  { %v290_v24 = vsel %vm287_vm13, %v289_v22, %v285_v21 }
 0x531   :  { %v293_v26 = vmul.f32 %v290_v24, %v235_v62  ;;  %v86_v62 = vpop.f32.mrf.mxu0 }
 0x532   :  { %v87_v63 = vadd.f32 %v1051_v10, %v86_v62 }
 0x58e   :  { %v296_v23 = vpop.permute.xlu0 %295 }
 0x58f   :  { %v298_v25 = vmul.f32 %v296_v23, %v290_v24 }
 0x591   :  { %300 = vrot.lane.b32.xlu1 %v298_v25, %s957_s10 }
 0x603   :  { %v301_v27 = vpop.permute.xlu1 %300 }
 0x604   :  { %v303_v28 = vadd.f32 %v301_v27, %v293_v26  ;;  %v659_v26 = vld [vmem:[%s1205_s3 + $0x18] sm:$0xff]  ;;  %v658_v27 = vld [vmem:[%s1205_s3 + $0x10] sm:$0xff] }
 0x605   :  { %852 = vmatpush.msra.mxu3 %v659_v26 }
 0x606   :  { %882 = vtanh.f32 %v303_v28 }
 0x607   :  { %853 = vmatpush.msra.mxu3 %v658_v27 }
 0x60c   :  { %v883_v29 = vpop.eup %882 }
 0x60d   :  { %306 = vrot.lane.b32.xlu2 %v883_v29, %s956_s7  ;;  %v657_v29 = vld [vmem:[%s1205_s3 + $0x8] sm:$0xff] }
 0x60e   :  { %854 = vmatpush.msra.mxu3 %v657_v29 }
 0x610   :  { %855 = vmatpush.msra.mxu3 %v656_v30 }
 0x667   :  { %v307_v31 = vpop.permute.xlu2 %306 }
 0x668   :  { %v309_v32 = vmul.f32 %v307_v31, %v290_v24 }
 0x66a   :  { %311 = vrot.lane.b32.xlu0 %v309_v32, %s957_s10 }
 0x6dc   :  { %v312_v33 = vpop.permute.xlu0 %311 }
 0x6dd   :  { %315 = vst.msk [vmem:[#allocation3 + $0x10] sm:$0xff] %vm109_vm1, %v312_v33  ;;  %833 = vmatmul.msk.f32.vlgmr.msra.gmra.mxu1 %vm109_vm1, %v312_v33 }
 0x6de   :  { %706 = vmatpush.msra.mxu1 %v659_v26 }
 0x6e0   :  { %707 = vmatpush.msra.mxu1 %v658_v27 }
 0x6e2   :  { %708 = vmatpush.msra.mxu1 %v657_v29 }
 0x6e4   :  { %709 = vmatpush.msra.mxu1 %v656_v30 }
 0x75a   :  { %v337_v36 = vpop.f32.mrf.mxu1 }
 0x75b   :  { %v340_v37 = vadd.f32 %v337_v36, %v84_v35 }
 0x75d   :  { %884 = vtanh.f32 %v340_v37  ;;  %v834_v39 = vmul.f32 -1.442695, %v340_v37 }
 0x75f   :  { %886 = vpow2.f32 %v834_v39 }
 0x763   :  { %v885_v38 = vpop.eup %884 }
 0x764   :  { %363 = vrot.lane.b32.xlu1 %v885_v38, %s956_s7 }
 0x765   :  { %v887_v40 = vpop.eup %886 }
 0x766   :  { %v344_v41 = vadd.f32 1.0, %v887_v40 }
 0x768   :  { %888 = vrcp.f32 %v344_v41  ;;  %v356_v47 = vand.u32 2147483648, %v344_v41  ;;  %vm350_vm15 = vweird.f32 %v344_v41  ;;  %v354_v48 = vand.u32 2147483647, %v344_v41 }
 0x76a   :  { %v357_v50 = vor.u32 1.1754944e-38, %v356_v47  ;;  %vm355_vm3 = vcmp.eq.f32.partialorder %v354_v48, 8.507059e+37 }
 0x76e   :  { %v889_v42 = vpop.eup %888 }
 0x76f   :  { %v346_v43 = vmul.f32 %v889_v42, %v344_v41  ;;  %vm351_vm14 = vweird.f32 %v889_v42 }
 0x770   :  { %vm352_vm2 = vmor %vm350_vm15, %vm351_vm14 }
 0x771   :  { %v347_v44 = vsub.f32 1.0, %v346_v43 }
 0x773   :  { %v348_v45 = vmul.f32 %v889_v42, %v347_v44 }
 0x775   :  { %v349_v46 = vadd.f32 %v889_v42, %v348_v45 }
 0x777   :  { %v353_v49 = vsel %vm352_vm2, %v889_v42, %v349_v46 }
 0x778   :  { %v358_v52 = vsel %vm355_vm3, %v357_v50, %v353_v49 }
 0x779   :  { %v361_v54 = vmul.f32 %v358_v52, %v303_v28  ;;  %v28_v28 = vld [vmem:[%s1203_s0 + $0x28] sm:$0xff] }
 0x77a   :  { %824 = vmatmul.msk.f32.gmra.mxu0 %vm32_vm0, %v28_v28 }
 0x7d6   :  { %v364_v51 = vpop.permute.xlu1 %363 }
 0x7d7   :  { %v366_v53 = vmul.f32 %v364_v51, %v358_v52 }
 0x7d9   :  { %368 = vrot.lane.b32.xlu2 %v366_v53, %s957_s10 }
 0x7f7   :  { %v89_v33 = vpop.f32.mrf.mxu0 }
 0x7f8   :  { %v90_v34 = vadd.f32 %v1051_v10, %v89_v33 }
 0x833   :  { %v369_v55 = vpop.permute.xlu2 %368 }
 0x834   :  { %v371_v56 = vadd.f32 %v369_v55, %v361_v54 }
 0x836   :  { %890 = vtanh.f32 %v371_v56 }
 0x83c   :  { %v891_v57 = vpop.eup %890 }
 0x83d   :  { %374 = vrot.lane.b32.xlu0 %v891_v57, %s956_s7  ;;  %v29_v57 = vld [vmem:[%s1203_s0 + $0x30] sm:$0xff] }
 0x83e   :  { %825 = vmatmul.msk.f32.gmra.mxu0 %vm32_vm0, %v29_v57 }
 0x8af   :  { %v375_v58 = vpop.permute.xlu0 %374 }
 0x8b0   :  { %v377_v59 = vmul.f32 %v375_v58, %v358_v52 }
 0x8b2   :  { %379 = vrot.lane.b32.xlu1 %v377_v59, %s957_s10 }
 0x924   :  { %v380_v61 = vpop.permute.xlu1 %379 }
 0x925   :  { %383 = vst.msk [vmem:[#allocation3 + $0x18] sm:$0xff] %vm109_vm1, %v380_v61  ;;  %835 = vmatmul.msk.f32.vlgmr.msrb.gmra.mxu2 %vm109_vm1, %v380_v61  ;;  %v661_v61 = vld [vmem:[#allocation3] sm:$0xff] }
 0x9a8   :  { %v405_v0 = vpop.f32.mrf.mxu2 }
 0x9a9   :  { %v408_v1 = vadd.f32 %v405_v0, %v87_v63  ;;  %v662_v63 = vld [vmem:[#allocation3 + $0x8] sm:$0xff]  ;;  %v663_v0 = vld [vmem:[#allocation3 + $0x10] sm:$0xff] }
 0x9ab   :  { %892 = vtanh.f32 %v408_v1  ;;  %v836_v3 = vmul.f32 -1.442695, %v408_v1  ;;  %v664_v1 = vld [vmem:[#allocation3 + $0x18] sm:$0xff] }
 0x9ad   :  { %894 = vpow2.f32 %v836_v3 }
 0x9b1   :  { %v893_v2 = vpop.eup %892 }
 0x9b2   :  { %431 = vrot.lane.b32.xlu2 %v893_v2, %s956_s7  ;;  %v92_v2 = vpop.f32.mrf.mxu0 }
 0x9b3   :  { %v895_v4 = vpop.eup %894  ;;  %v93_v3 = vadd.f32 %v1051_v10, %v92_v2 }
 0x9b4   :  { %v412_v5 = vadd.f32 1.0, %v895_v4 }
 0x9b6   :  { %896 = vrcp.f32 %v412_v5  ;;  %v424_v13 = vand.u32 2147483648, %v412_v5  ;;  %vm418_vm5 = vweird.f32 %v412_v5  ;;  %v422_v14 = vand.u32 2147483647, %v412_v5 }
 0x9b8   :  { %v425_v16 = vor.u32 1.1754944e-38, %v424_v13  ;;  %vm423_vm7 = vcmp.eq.f32.partialorder %v422_v14, 8.507059e+37 }
 0x9bc   :  { %v897_v6 = vpop.eup %896 }
 0x9bd   :  { %v414_v7 = vmul.f32 %v897_v6, %v412_v5  ;;  %vm419_vm4 = vweird.f32 %v897_v6 }
 0x9be   :  { %vm420_vm6 = vmor %vm418_vm5, %vm419_vm4 }
 0x9bf   :  { %v415_v9 = vsub.f32 1.0, %v414_v7 }
 0x9c1   :  { %v416_v11 = vmul.f32 %v897_v6, %v415_v9 }
 0x9c3   :  { %v417_v12 = vadd.f32 %v897_v6, %v416_v11 }
 0x9c5   :  { %v421_v15 = vsel %vm420_vm6, %v897_v6, %v417_v12 }
 0x9c6   :  { %v426_v18 = vsel %vm423_vm7, %v425_v16, %v421_v15 }
 0x9c7   :  { %v429_v20 = vmul.f32 %v426_v18, %v371_v56 }
 0xa0c   :  { %v432_v17 = vpop.permute.xlu2 %431 }
 0xa0d   :  { %v434_v19 = vmul.f32 %v432_v17, %v426_v18 }
 0xa0f   :  { %436 = vrot.lane.b32.xlu0 %v434_v19, %s957_s10 }
 0xa81   :  { %v437_v21 = vpop.permute.xlu0 %436 }
 0xa82   :  { %v439_v22 = vadd.f32 %v437_v21, %v429_v20 }
 0xa84   :  { %898 = vtanh.f32 %v439_v22 }
 0xa8a   :  { %v899_v23 = vpop.eup %898 }
 0xa8b   :  { %442 = vrot.lane.b32.xlu1 %v899_v23, %s956_s7 }
 0xafd   :  { %v443_v24 = vpop.permute.xlu1 %442 }
 0xafe   :  { %v445_v25 = vmul.f32 %v443_v24, %v426_v18 }
 0xb00   :  { %447 = vrot.lane.b32.xlu2 %v445_v25, %s957_s10 }
 0xb5a   :  { %v448_v31 = vpop.permute.xlu2 %447 }
 0xb5b   :  { %451 = vst.msk [vmem:[#allocation3 + $0x20] sm:$0xff] %vm109_vm1, %v448_v31  ;;  %837 = vmatmul.msk.f32.vlgmr.msrb.gmra.mxu3 %vm109_vm1, %v448_v31 }
 0xb62   :  { %v665_v32 = vld [vmem:[#allocation3 + $0x20] sm:$0xff] }
 0xb63   :  { %847 = vmatmul.msk.f32.vlgmr.msra.gmra.mxu3 %vm109_vm1, %v665_v32  ;;  %v96_v32 = vadd.f32 %v1051_v10, %v1046_v8 }
 0xbde   :  { %v473_v35 = vpop.f32.mrf.mxu3 }
 0xbdf   :  { %v476_v36 = vadd.f32 %v473_v35, %v90_v34 }
 0xbe1   :  { %900 = vtanh.f32 %v476_v36  ;;  %v838_v38 = vmul.f32 -1.442695, %v476_v36 }
 0xbe3   :  { %902 = vpow2.f32 %v838_v38 }
 0xbe7   :  { %v901_v37 = vpop.eup %900 }
 0xbe8   :  { %499 = vrot.lane.b32.xlu0 %v901_v37, %s956_s7 }
 0xbe9   :  { %v903_v39 = vpop.eup %902 }
 0xbea   :  { %v480_v40 = vadd.f32 1.0, %v903_v39 }
 0xbec   :  { %904 = vrcp.f32 %v480_v40  ;;  %v492_v46 = vand.u32 2147483648, %v480_v40  ;;  %vm486_vm9 = vweird.f32 %v480_v40  ;;  %v490_v47 = vand.u32 2147483647, %v480_v40 }
 0xbee   :  { %v493_v49 = vor.u32 1.1754944e-38, %v492_v46  ;;  %vm491_vm11 = vcmp.eq.f32.partialorder %v490_v47, 8.507059e+37 }
 0xbf2   :  { %v905_v41 = vpop.eup %904 }
 0xbf3   :  { %v482_v42 = vmul.f32 %v905_v41, %v480_v40  ;;  %vm487_vm8 = vweird.f32 %v905_v41 }
 0xbf4   :  { %vm488_vm10 = vmor %vm486_vm9, %vm487_vm8 }
 0xbf5   :  { %v483_v43 = vsub.f32 1.0, %v482_v42 }
 0xbf7   :  { %v484_v44 = vmul.f32 %v905_v41, %v483_v43 }
 0xbf9   :  { %v485_v45 = vadd.f32 %v905_v41, %v484_v44 }
 0xbfb   :  { %v489_v48 = vsel %vm488_vm10, %v905_v41, %v485_v45 }
 0xbfc   :  { %v494_v51 = vsel %vm491_vm11, %v493_v49, %v489_v48 }
 0xbfd   :  { %v497_v53 = vmul.f32 %v494_v51, %v439_v22 }
 0xc5a   :  { %v500_v50 = vpop.permute.xlu0 %499 }
 0xc5b   :  { %v502_v52 = vmul.f32 %v500_v50, %v494_v51  ;;  %v1160_v50 = vld [vmem:[%s1205_s3 + $0x20] ss:$0 sm:$0xff] }
 0xc5d   :  { %504 = vrot.lane.b32.xlu1 %v502_v52, %s957_s10  ;;  %v723_v52 = vpop.f32.mrf.mxu3 }
 0xccf   :  { %v505_v54 = vpop.permute.xlu1 %504 }
 0xcd0   :  { %v507_v55 = vadd.f32 %v505_v54, %v497_v53  ;;  %v724_v53 = vadd.f32 %v1160_v50, %v723_v52 }
 0xcd2   :  { %906 = vtanh.f32 %v507_v55 }
 0xcd8   :  { %v907_v56 = vpop.eup %906 }
 0xcd9   :  { %510 = vrot.lane.b32.xlu2 %v907_v56, %s956_s7 }
 0xd33   :  { %v511_v58 = vpop.permute.xlu2 %510 }
 0xd34   :  { %v513_v59 = vmul.f32 %v511_v58, %v494_v51 }
 0xd36   :  { %515 = vrot.lane.b32.xlu0 %v513_v59, %s957_s10 }
 0xda8   :  { %v516_v60 = vpop.permute.xlu0 %515 }
 0xda9   :  { %519 = vst.msk [vmem:[#allocation3 + $0x28] sm:$0xff] %vm109_vm1, %v516_v60  ;;  %839 = vmatmul.msk.f32.vlgmr.msrb.gmra.mxu1 %vm109_vm1, %v516_v60 }
 0xdb0   :  { %v666_v62 = vld [vmem:[#allocation3 + $0x28] sm:$0xff] }
 0xdb1   :  { %843 = vmatmul.msk.f32.vlgmr.msra.gmra.mxu1 %vm109_vm1, %v661_v61  ;;  %848 = vmatmul.msk.f32.gmra.mxu3 %vm109_vm1, %v666_v62 }
 0xdb9   :  { %844 = vmatmul.msk.f32.gmra.mxu1 %vm109_vm1, %v662_v63 }
 0xdc1   :  { %845 = vmatmul.msk.f32.gmra.mxu1 %vm109_vm1, %v663_v0 }
 0xdc9   :  { %846 = vmatmul.msk.f32.gmra.mxu1 %vm109_vm1, %v664_v1 }
 0xe26   :  { %v541_v4 = vpop.f32.mrf.mxu1 }
 0xe27   :  { %v544_v5 = vadd.f32 %v541_v4, %v93_v3 }
 0xe29   :  { %908 = vtanh.f32 %v544_v5  ;;  %v840_v7 = vmul.f32 -1.442695, %v544_v5 }
 0xe2b   :  { %910 = vpow2.f32 %v840_v7 }
 0xe2e   :  { %v711_v49 = vpop.f32.mrf.mxu1 }
 0xe2f   :  { %v909_v6 = vpop.eup %908  ;;  %v712_v51 = vadd.f32 %v1160_v50, %v711_v49 }
 0xe30   :  { %567 = vrot.lane.b32.xlu1 %v909_v6, %s956_s7 }
 0xe31   :  { %v911_v9 = vpop.eup %910 }
 0xe32   :  { %v548_v11 = vadd.f32 1.0, %v911_v9 }
 0xe34   :  { %912 = vrcp.f32 %v548_v11  ;;  %v560_v17 = vand.u32 2147483648, %v548_v11  ;;  %vm554_vm12 = vweird.f32 %v548_v11  ;;  %v558_v18 = vand.u32 2147483647, %v548_v11  ;;  %v726_v62 = vpop.f32.mrf.mxu3 }
 0xe35   :  { %v1167_v0 = vadd.f32 %v1160_v50, %v726_v62 }
 0xe36   :  { %v561_v20 = vor.u32 1.1754944e-38, %v560_v17  ;;  %vm559_vm14 = vcmp.eq.f32.partialorder %v558_v18, 8.507059e+37  ;;  %v714_v58 = vpop.f32.mrf.mxu1 }
 0xe37   :  { %v715_v59 = vadd.f32 %v1160_v50, %v714_v58 }
 0xe3a   :  { %v913_v12 = vpop.eup %912 }
 0xe3b   :  { %v550_v13 = vmul.f32 %v913_v12, %v548_v11  ;;  %vm555_vm0 = vweird.f32 %v913_v12 }
 0xe3c   :  { %vm556_vm13 = vmor %vm554_vm12, %vm555_vm0 }
 0xe3d   :  { %v551_v14 = vsub.f32 1.0, %v550_v13 }
 0xe3e   :  { %v717_v4 = vpop.f32.mrf.mxu1 }
 0xe3f   :  { %v552_v15 = vmul.f32 %v913_v12, %v551_v14  ;;  %v718_v5 = vadd.f32 %v1160_v50, %v717_v4 }
 0xe41   :  { %v553_v16 = vadd.f32 %v913_v12, %v552_v15 }
 0xe43   :  { %v557_v19 = vsel %vm556_vm13, %v913_v12, %v553_v16 }
 0xe44   :  { %v562_v22 = vsel %vm559_vm14, %v561_v20, %v557_v19 }
 0xe45   :  { %v565_v24 = vmul.f32 %v562_v22, %v507_v55 }
 0xe46   :  { %v720_v7 = vpop.f32.mrf.mxu1 }
 0xe47   :  { %v721_v9 = vadd.f32 %v1160_v50, %v720_v7 }
 0xea2   :  { %v568_v21 = vpop.permute.xlu1 %567 }
 0xea3   :  { %v570_v23 = vmul.f32 %v568_v21, %v562_v22 }
 0xea5   :  { %572 = vrot.lane.b32.xlu2 %v570_v23, %s957_s10 }
 0xeff   :  { %v573_v25 = vpop.permute.xlu2 %572 }
 0xf00   :  { %v575_v26 = vadd.f32 %v573_v25, %v565_v24 }
 0xf02   :  { %914 = vtanh.f32 %v575_v26 }
 0xf08   :  { %v915_v27 = vpop.eup %914 }
 0xf09   :  { %578 = vrot.lane.b32.xlu0 %v915_v27, %s956_s7 }
 0xf7b   :  { %v579_v28 = vpop.permute.xlu0 %578 }
 0xf7c   :  { %v581_v29 = vmul.f32 %v579_v28, %v562_v22 }
 0xf7e   :  { %583 = vrot.lane.b32.xlu1 %v581_v29, %s957_s10 }
 0xff0   :  { %v584_v30 = vpop.permute.xlu1 %583 }
 0xff1   :  { %587 = vst.msk [vmem:[#allocation3 + $0x30] sm:$0xff] %vm109_vm1, %v584_v30  ;;  %841 = vmatmul.msk.f32.vlgmr.msra.gmra.mxu2 %vm109_vm1, %v584_v30 }
 0xff8   :  { %v667_v31 = vld [vmem:[#allocation3 + $0x30] sm:$0xff] }
 0xff9   :  { %849 = vmatmul.msk.f32.gmra.mxu3 %vm109_vm1, %v667_v31 }
0x1074   :  { %v609_v33 = vpop.f32.mrf.mxu2 }
0x1075   :  { %v612_v34 = vadd.f32 %v609_v33, %v96_v32 }
0x1077   :  { %916 = vtanh.f32 %v612_v34  ;;  %v842_v36 = vmul.f32 -1.442695, %v612_v34 }
0x1079   :  { %918 = vpow2.f32 %v842_v36 }
0x107c   :  { %v729_v13 = vpop.f32.mrf.mxu3 }
0x107d   :  { %v917_v35 = vpop.eup %916  ;;  %v730_v15 = vadd.f32 %v1160_v50, %v729_v13 }
0x107e   :  { %635 = vrot.lane.b32.xlu2 %v917_v35, %s956_s7 }
0x107f   :  { %v919_v37 = vpop.eup %918 }
0x1080   :  { %v616_v38 = vadd.f32 1.0, %v919_v37 }
0x1082   :  { %920 = vrcp.f32 %v616_v38  ;;  %v628_v44 = vand.u32 2147483648, %v616_v38  ;;  %vm622_vm2 = vweird.f32 %v616_v38  ;;  %v626_v8 = vand.u32 2147483647, %v616_v38 }
0x1084   :  { %v629_v45 = vor.u32 1.1754944e-38, %v628_v44  ;;  %vm627_vm4 = vcmp.eq.f32.partialorder %v626_v8, 8.507059e+37 }
0x1088   :  { %v921_v39 = vpop.eup %920 }
0x1089   :  { %v618_v40 = vmul.f32 %v921_v39, %v616_v38  ;;  %vm623_vm15 = vweird.f32 %v921_v39 }
0x108a   :  { %vm624_vm3 = vmor %vm622_vm2, %vm623_vm15 }
0x108b   :  { %v619_v41 = vsub.f32 1.0, %v618_v40 }
0x108d   :  { %v620_v42 = vmul.f32 %v921_v39, %v619_v41 }
0x108f   :  { %v621_v43 = vadd.f32 %v921_v39, %v620_v42 }
0x1091   :  { %v625_v10 = vsel %vm624_vm3, %v921_v39, %v621_v43 }
0x1092   :  { %v630_v47 = vsel %vm627_vm4, %v629_v45, %v625_v10 }
0x1093   :  { %v633_v54 = vmul.f32 %v630_v47, %v575_v26 }
0x10d8   :  { %v636_v46 = vpop.permute.xlu2 %635 }
0x10d9   :  { %v638_v48 = vmul.f32 %v636_v46, %v630_v47 }
0x10db   :  { %640 = vrot.lane.b32.xlu0 %v638_v48, %s957_s10 }
0x1105   :  { %735 = vmax.xlane.f32.xlu0 %v712_v51 }
0x110d   :  { %743 = vmax.xlane.f32.xlu0 %v724_v53 }
0x114d   :  { %v641_v55 = vpop.permute.xlu0 %640 }
0x114e   :  { %v643_v56 = vadd.f32 %v641_v55, %v633_v54 }
0x1150   :  { %922 = vtanh.f32 %v643_v56 }
0x1156   :  { %v923_v57 = vpop.eup %922 }
0x1157   :  { %646 = vrot.lane.b32.xlu1 %v923_v57, %s956_s7 }
0x1178   :  { %v736_v60 = vpop.xlane.xlu0 %735 }
0x1179   :  { %v751_v61 = vsub.f32 %v712_v51, %v736_v60 }
0x117b   :  { %v759_v63 = vmul.f32 1.442695, %v751_v61 }
0x117d   :  { %924 = vpow2.f32 %v759_v63 }
0x1180   :  { %v744_v16 = vpop.xlane.xlu0 %743 }
0x1181   :  { %737 = vmax.xlane.f32.xlu1 %v715_v59  ;;  %v755_v18 = vsub.f32 %v724_v53, %v744_v16 }
0x1183   :  { %v925_v1 = vpop.eup %924  ;;  %v767_v19 = vmul.f32 1.442695, %v755_v18 }
0x1189   :  { %745 = vmax.xlane.f32.xlu1 %v1167_v0 }
0x1191   :  { %775 = vadd.xlane.f32.xlu1 %v925_v1 }
0x11c9   :  { %v647_v2 = vpop.permute.xlu1 %646 }
0x11ca   :  { %v649_v3 = vmul.f32 %v647_v2, %v630_v47 }
0x11cc   :  { %651 = vrot.lane.b32.xlu2 %v649_v3, %s957_s10 }
0x11f4   :  { %v738_v6 = vpop.xlane.xlu1 %737 }
0x11f5   :  { %739 = vmax.xlane.f32.xlu2 %v718_v5  ;;  %v752_v12 = vsub.f32 %v715_v59, %v738_v6 }
0x11f7   :  { %v761_v14 = vmul.f32 1.442695, %v752_v12 }
0x11fc   :  { %v746_v11 = vpop.xlane.xlu1 %745 }
0x11fd   :  { %741 = vmax.xlane.f32.xlu2 %v721_v9  ;;  %v756_v8 = vsub.f32 %v1167_v0, %v746_v11 }
0x11ff   :  { %v769_v10 = vmul.f32 1.442695, %v756_v8 }
0x1204   :  { %v776_v17 = vpop.xlane.xlu1 %775 }
0x1205   :  { %926 = vrcp.f32 %v776_v17  ;;  %747 = vmax.xlane.f32.xlu2 %v730_v15 }
0x1206   :  { %928 = vpow2.f32 %v761_v14 }
0x1207   :  { %930 = vpow2.f32 %v767_v19 }
0x120b   :  { %v927_v20 = vpop.eup %926 }
0x120c   :  { %v929_v21 = vpop.eup %928  ;;  %v799_v22 = vmul.f32 %v927_v20, %v925_v1 }
0x120d   :  { %777 = vadd.xlane.f32.xlu2 %v929_v21  ;;  %v931_v23 = vpop.eup %930 }
0x120e   :  { %807 = vst [vmem:[%s1206_s4] sm:$0xff] %v799_v22 }
0x1215   :  { %783 = vadd.xlane.f32.xlu2 %v931_v23 }
0x1226   :  { %v652_v24 = vpop.permute.xlu2 %651 }
0x1227   :  { %655 = vst.msk [vmem:[#allocation3 + $0x38] sm:$0xff] %vm109_vm1, %v652_v24 }
0x122e   :  { %v668_v25 = vld [vmem:[#allocation3 + $0x38] sm:$0xff] }
0x122f   :  { %850 = vmatmul.msk.f32.gmra.mxu3 %vm109_vm1, %v668_v25 }
0x1268   :  { %v740_v26 = vpop.xlane.xlu2 %739 }
0x1269   :  { %v753_v41 = vsub.f32 %v718_v5, %v740_v26 }
0x126b   :  { %v763_v42 = vmul.f32 1.442695, %v753_v41 }
0x1270   :  { %v742_v27 = vpop.xlane.xlu2 %741 }
0x1271   :  { %v754_v28 = vsub.f32 %v721_v9, %v742_v27 }
0x1273   :  { %v765_v29 = vmul.f32 1.442695, %v754_v28 }
0x1275   :  { %932 = vpow2.f32 %v765_v29 }
0x1278   :  { %v748_v30 = vpop.xlane.xlu2 %747 }
0x1279   :  { %v757_v31 = vsub.f32 %v730_v15, %v748_v30 }
0x127b   :  { %v933_v32 = vpop.eup %932  ;;  %v771_v33 = vmul.f32 1.442695, %v757_v31 }
0x127c   :  { %781 = vadd.xlane.f32.xlu1 %v933_v32 }
0x127d   :  { %934 = vpow2.f32 %v771_v33 }
0x1280   :  { %v778_v34 = vpop.xlane.xlu2 %777 }
0x1281   :  { %936 = vrcp.f32 %v778_v34 }
0x1283   :  { %v935_v35 = vpop.eup %934 }
0x1284   :  { %787 = vadd.xlane.f32.xlu1 %v935_v35 }
0x1287   :  { %v937_v36 = vpop.eup %936 }
0x1288   :  { %v800_v37 = vmul.f32 %v937_v36, %v929_v21  ;;  %v784_v38 = vpop.xlane.xlu2 %783 }
0x1289   :  { %938 = vrcp.f32 %v784_v38 }
0x128a   :  { %808 = vst [vmem:[%s1206_s4 + $0x8] sm:$0xff] %v800_v37  ;;  %940 = vpow2.f32 %v763_v42 }
0x128b   :  { %942 = vpow2.f32 %v769_v10 }
0x128f   :  { %v939_v39 = vpop.eup %938 }
0x1290   :  { %v803_v40 = vmul.f32 %v939_v39, %v931_v23  ;;  %v941_v45 = vpop.eup %940 }
0x1291   :  { %v943_v46 = vpop.eup %942 }
0x1292   :  { %811 = vst [vmem:[%s1206_s4 + $0x20] sm:$0xff] %v803_v40 }
0x12b2   :  { %v732_v43 = vpop.f32.mrf.mxu3 }
0x12b3   :  { %v733_v44 = vadd.f32 %v1160_v50, %v732_v43 }
0x12b5   :  { %749 = vmax.xlane.f32.xlu0 %v733_v44 }
0x12bd   :  { %779 = vadd.xlane.f32.xlu0 %v941_v45 }
0x12c5   :  { %785 = vadd.xlane.f32.xlu0 %v943_v46 }
0x12ef   :  { %v782_v47 = vpop.xlane.xlu1 %781 }
0x12f0   :  { %944 = vrcp.f32 %v782_v47 }
0x12f6   :  { %v945_v48 = vpop.eup %944 }
0x12f7   :  { %v802_v49 = vmul.f32 %v945_v48, %v933_v32  ;;  %v788_v51 = vpop.xlane.xlu1 %787 }
0x12f8   :  { %946 = vrcp.f32 %v788_v51 }
0x12f9   :  { %810 = vst [vmem:[%s1206_s4 + $0x18] sm:$0xff] %v802_v49 }
0x12fe   :  { %v947_v50 = vpop.eup %946 }
0x12ff   :  { %v805_v52 = vmul.f32 %v947_v50, %v935_v35 }
0x1301   :  { %813 = vst [vmem:[%s1206_s4 + $0x30] sm:$0xff] %v805_v52 }
0x1328   :  { %v750_v53 = vpop.xlane.xlu0 %749 }
0x1329   :  { %v758_v54 = vsub.f32 %v733_v44, %v750_v53 }
0x132b   :  { %v773_v55 = vmul.f32 1.442695, %v758_v54 }
0x132d   :  { %948 = vpow2.f32 %v773_v55 }
0x1330   :  { %v780_v56 = vpop.xlane.xlu0 %779 }
0x1331   :  { %950 = vrcp.f32 %v780_v56 }
0x1333   :  { %v949_v57 = vpop.eup %948 }
0x1334   :  { %789 = vadd.xlane.f32.xlu2 %v949_v57 }
0x1337   :  { %v951_v58 = vpop.eup %950 }
0x1338   :  { %v801_v59 = vmul.f32 %v951_v58, %v941_v45  ;;  %v786_v60 = vpop.xlane.xlu0 %785 }
0x1339   :  { %952 = vrcp.f32 %v786_v60 }
0x133a   :  { %809 = vst [vmem:[%s1206_s4 + $0x10] sm:$0xff] %v801_v59 }
0x133f   :  { %v953_v61 = vpop.eup %952 }
0x1340   :  { %v804_v62 = vmul.f32 %v953_v61, %v943_v46 }
0x1342   :  { %812 = vst [vmem:[%s1206_s4 + $0x28] sm:$0xff] %v804_v62 }
0x13a7   :  { %v790_v63 = vpop.xlane.xlu2 %789 }
0x13a8   :  { %954 = vrcp.f32 %v790_v63 }
0x13ae   :  { %v955_v0 = vpop.eup %954 }
0x13af   :  { %v806_v1 = vmul.f32 %v955_v0, %v949_v57 }
0x13b1   :  { %814 = vst [vmem:[%s1206_s4 + $0x38] sm:$0xff] %v806_v1 }

</bundles_post_ra>
